<compile_context>
chip_gen: v7x
topology: tpu7x:2x2x1
jax: 0.10.0
libtpu: 0.0.40
codegen_flags: <defaults>
</compile_context>

<pallas_src>
import functools

import jax
import jax.numpy as jnp
from jax import lax
from jax.experimental import pallas as pl
from jax.experimental.pallas import tpu as pltpu


def _label_smoothing_kernel(x_ref, t_ref, o_ref, *, eps, num_classes,
                            ignore_index, n_tokens):
    # x_ref: (TM, V) logits tile (any float dtype, cast here)
    # t_ref: (TM, 1) int32 targets tile
    # o_ref: (1, 1, TM) f32 per-token loss tile (lane-dense)
    logits = x_ref[...].astype(jnp.float32)                 # (TM, V)
    tgt = t_ref[...]                                        # (TM, 1) int32
    tm, v = logits.shape

    # numerically stable log-softmax pieces (row-wise)
    m = jnp.max(logits, axis=-1, keepdims=True)             # (TM, 1)
    shifted = logits - m                                    # (TM, V)
    lse = jnp.log(jnp.sum(jnp.exp(shifted), axis=-1, keepdims=True))  # (TM, 1)

    # target logit via iota compare (no gather) + full-row sum of shifted
    col = lax.broadcasted_iota(jnp.int32, (tm, v), 1)
    sum_shift = jnp.sum(shifted, axis=-1, keepdims=True)    # (TM, 1)
    tgt_shift = jnp.sum(jnp.where(col == tgt, shifted, 0.0),
                        axis=-1, keepdims=True)             # (TM, 1)

    # loss = -[(eps/C) * sum_j lp_j + (1 - eps - eps/C) * lp_tgt]
    #   sum_j lp_j = sum_shift - V*lse ;  lp_tgt = tgt_shift - lse
    uni = eps / num_classes
    w_tgt = 1.0 - eps - uni
    loss = -(uni * (sum_shift - float(v) * lse) + w_tgt * (tgt_shift - lse))

    # mask ignore_index rows and (garbage) rows past the real token count
    row0 = pl.program_id(0) * tm
    rid = row0 + lax.broadcasted_iota(jnp.int32, (tm, 1), 0)
    valid = (rid < n_tokens) & (tgt != ignore_index)
    loss = jnp.where(valid, loss, 0.0)

    # lane-dense store: (TM, 1) -> (1, 1, TM)
    o_ref[...] = loss.reshape(1, 1, tm)


def _vmem_capacity_bytes():
    try:
        return int(pltpu.get_tpu_info().vmem_capacity_bytes)
    except Exception:
        return 64 * 1024 * 1024  # conservative (v7x-sized) fallback


def _choose_tile_m(n_rows, vocab, in_itemsize, vmem_budget_bytes):
    # VMEM per tile row: double-buffered input tile + ~3 live f32 working tiles.
    per_row = 2 * vocab * in_itemsize + 3 * vocab * 4 + 64
    tm = vmem_budget_bytes // per_row
    tm = int(max(8, min(tm, 512)))
    # never taller than the (sublane-rounded) token count; the ragged tail is
    # handled by a partial last block + the in-kernel row mask.
    if n_rows >= 8:
        tm = min(tm, (n_rows // 8) * 8)
    if tm >= 128:
        tm = (tm // 128) * 128   # lane-dense output width -> unmasked stores
    else:
        tm = max(8, (tm // 8) * 8)
    return tm


def label_smoothing_loss(output, target, *, label_smoothing, tgt_vocab_size,
                         ignore_index=-100, tile_m=None):
    """output: float logits [..., V]; target: int labels [...]. Returns loss [...]."""
    assert 0.0 < label_smoothing <= 1.0
    orig_shape = target.shape
    V = output.shape[-1]
    assert V == tgt_vocab_size

    x = output.reshape(-1, V)                     # keep HBM dtype (bf16 stays bf16)
    t = target.reshape(-1, 1).astype(jnp.int32)
    N = x.shape[0]

    # Degenerate tiny-N case only: pad to one sublane group (cheap, <8 rows).
    if N < 8:
        pad = 8 - N
        x = jnp.concatenate([x, jnp.zeros((pad, V), x.dtype)], axis=0)
        t = jnp.concatenate([t, jnp.full((pad, 1), ignore_index, t.dtype)], axis=0)
    Nrows = x.shape[0]

    itemsize = jnp.dtype(x.dtype).itemsize
    vmem_cap = _vmem_capacity_bytes()
    if tile_m is None:
        tile_m = _choose_tile_m(Nrows, V, itemsize, int(vmem_cap * 0.55))
    grid_m = pl.cdiv(Nrows, tile_m)

    kernel = functools.partial(
        _label_smoothing_kernel,
        eps=float(label_smoothing),
        num_classes=int(tgt_vocab_size),
        ignore_index=int(ignore_index),
        n_tokens=int(N),
    )

    # scoped-VMEM sizing for the chosen tile (double-buffered input + f32 temps)
    vmem_need = 2 * tile_m * V * itemsize + 3 * tile_m * V * 4 + 16 * tile_m * 4
    vmem_limit = int(max(32 << 20, min(vmem_need * 5 // 4, int(vmem_cap * 0.85))))

    loss = pl.pallas_call(
        kernel,
        out_shape=jax.ShapeDtypeStruct((grid_m, 1, tile_m), jnp.float32),
        grid_spec=pltpu.PrefetchScalarGridSpec(
            num_scalar_prefetch=0,
            grid=(grid_m,),
            in_specs=[
                pl.BlockSpec((tile_m, V), lambda i: (i, 0)),
                pl.BlockSpec((tile_m, 1), lambda i: (i, 0)),
            ],
            out_specs=pl.BlockSpec((1, 1, tile_m), lambda i: (i, 0, 0)),
        ),
        compiler_params=pltpu.CompilerParams(
            dimension_semantics=("parallel",),
            vmem_limit_bytes=vmem_limit,
        ),
    )(x, t)

    return loss.reshape(-1)[:N].reshape(orig_shape)


def _reference(output, target, eps, num_classes, ignore_index=-100):
    non_pad = (target != ignore_index).astype(jnp.float32)
    t = jnp.where(target == ignore_index, 0, target)
    one_hot = jax.nn.one_hot(t, num_classes, dtype=jnp.float32)
    one_hot = one_hot * (1 - eps) + (1 - one_hot) * eps / num_classes
    log_prb = jax.nn.log_softmax(output.astype(jnp.float32), axis=-1)
    loss = -(one_hot * log_prb).sum(-1)
    return loss * non_pad


if __name__ == "__main__":
    B, S, V = 2, 8, 32
    eps = 0.1
    ignore_index = -100

    key = jax.random.PRNGKey(0)
    k1, k2, k3 = jax.random.split(key, 3)

    logits = jax.random.normal(k1, (B, S, V), dtype=jnp.float32)
    target = jax.random.randint(k2, (B, S), 0, V, dtype=jnp.int32)
    pad_mask = jax.random.bernoulli(k3, 0.25, (B, S))
    target = jnp.where(pad_mask, ignore_index, target)

    # f32 logits path
    loss = label_smoothing_loss(
        logits, target,
        label_smoothing=eps, tgt_vocab_size=V, ignore_index=ignore_index)
    loss = jax.block_until_ready(loss)
    ref = _reference(logits, target, eps, V, ignore_index)
    assert loss.shape == target.shape
    assert jnp.allclose(loss, ref, atol=1e-5, rtol=1e-5), (loss, ref)

    # bf16 logits path (no wrapper upcast; cast happens per-tile in the kernel)
    logits_bf16 = logits.astype(jnp.bfloat16)
    loss_bf16 = label_smoothing_loss(
        logits_bf16, target,
        label_smoothing=eps, tgt_vocab_size=V, ignore_index=ignore_index)
    loss_bf16 = jax.block_until_ready(loss_bf16)
    ref_bf16 = _reference(logits_bf16, target, eps, V, ignore_index)
    assert jnp.allclose(loss_bf16, ref_bf16, atol=1e-4, rtol=1e-4), (loss_bf16, ref_bf16)

    print("KERNEL_OK")
</pallas_src>

<mosaic_0001>
module attributes {stable_mosaic.version = 11 : i64} {
  func.func @_label_smoothing_kernel(%arg0: i32, %arg1: memref<16x32xf32, #tpu.memory_space<vmem>>, %arg2: memref<16x1xi32, #tpu.memory_space<vmem>>, %arg3: memref<1x1x16xf32, #tpu.memory_space<vmem>>) attributes {dimension_semantics = [#tpu.dimension_semantics<parallel>], iteration_bounds = array<i64: 1>, scalar_prefetch = 0 : i64, scratch_operands = 0 : i64, tpu.core_type = #tpu.core_type<tc>, window_params = [{transform_indices = @transform_0, window_bounds = array<i64: 16, 32>}, {transform_indices = @transform_1, window_bounds = array<i64: 16, 1>}, {transform_indices = @transform_2, window_bounds = array<i64: 1, 1, 16>}]} {
    %c0 = arith.constant 0 : index
    %c0_0 = arith.constant 0 : index
    %0 = vector.load %arg1[%c0, %c0_0] : memref<16x32xf32, #tpu.memory_space<vmem>>, vector<16x32xf32>
    %c0_1 = arith.constant 0 : index
    %c0_2 = arith.constant 0 : index
    %1 = vector.load %arg2[%c0_1, %c0_2] : memref<16x1xi32, #tpu.memory_space<vmem>>, vector<16x1xi32>
    %cst = arith.constant dense<0xFF800000> : vector<16xf32>
    %2 = vector.multi_reduction <maximumf>, %0, %cst [1] : vector<16x32xf32> to vector<16xf32>
    %3 = vector.shape_cast %2 : vector<16xf32> to vector<16x1xf32>
    %4 = vector.broadcast %3 : vector<16x1xf32> to vector<16x32xf32>
    %5 = arith.subf %0, %4 : vector<16x32xf32>
    %6 = math.exp %5 : vector<16x32xf32>
    %cst_3 = arith.constant dense<0.000000e+00> : vector<16xf32>
    %7 = vector.multi_reduction <add>, %6, %cst_3 [1] : vector<16x32xf32> to vector<16xf32>
    %8 = vector.shape_cast %7 : vector<16xf32> to vector<16x1xf32>
    %9 = math.log %8 : vector<16x1xf32>
    %10 = tpu.iota {dimensions = array<i32: 1>} : vector<16x32xi32>
    %cst_4 = arith.constant dense<0.000000e+00> : vector<16xf32>
    %11 = vector.multi_reduction <add>, %5, %cst_4 [1] : vector<16x32xf32> to vector<16xf32>
    %12 = vector.shape_cast %11 : vector<16xf32> to vector<16x1xf32>
    %13 = vector.broadcast %1 : vector<16x1xi32> to vector<16x32xi32>
    %14 = arith.cmpi eq, %10, %13 : vector<16x32xi32>
    %cst_5 = arith.constant 0.000000e+00 : f32
    %15 = vector.broadcast %cst_5 : f32 to vector<16x32xf32>
    %16 = arith.select %14, %5, %15 : vector<16x32xi1>, vector<16x32xf32>
    %cst_6 = arith.constant dense<0.000000e+00> : vector<16xf32>
    %17 = vector.multi_reduction <add>, %16, %cst_6 [1] : vector<16x32xf32> to vector<16xf32>
    %18 = vector.shape_cast %17 : vector<16xf32> to vector<16x1xf32>
    %cst_7 = arith.constant 3.200000e+01 : f32
    %19 = vector.broadcast %cst_7 : f32 to vector<16x1xf32>
    %20 = arith.mulf %19, %9 : vector<16x1xf32>
    %21 = arith.subf %12, %20 : vector<16x1xf32>
    %cst_8 = arith.constant 3.125000e-03 : f32
    %22 = vector.broadcast %cst_8 : f32 to vector<16x1xf32>
    %23 = arith.mulf %22, %21 : vector<16x1xf32>
    %24 = arith.subf %18, %9 : vector<16x1xf32>
    %cst_9 = arith.constant 8.968750e-01 : f32
    %25 = vector.broadcast %cst_9 : f32 to vector<16x1xf32>
    %26 = arith.mulf %25, %24 : vector<16x1xf32>
    %27 = arith.addf %23, %26 : vector<16x1xf32>
    %cst_10 = arith.constant 0.000000e+00 : f32
    %28 = vector.broadcast %cst_10 : f32 to vector<16x1xf32>
    %29 = arith.subf %28, %27 : vector<16x1xf32>
    %c16_i32 = arith.constant 16 : i32
    %30 = arith.muli %arg0, %c16_i32 : i32
    %31 = tpu.iota {dimensions = array<i32: 0>} : vector<16x1xi32>
    %32 = vector.broadcast %30 : i32 to vector<16x1xi32>
    %33 = arith.addi %32, %31 : vector<16x1xi32>
    %c16_i32_11 = arith.constant 16 : i32
    %34 = vector.broadcast %c16_i32_11 : i32 to vector<16x1xi32>
    %35 = arith.cmpi slt, %33, %34 : vector<16x1xi32>
    %c-100_i32 = arith.constant -100 : i32
    %36 = vector.broadcast %c-100_i32 : i32 to vector<16x1xi32>
    %37 = arith.cmpi ne, %1, %36 : vector<16x1xi32>
    %38 = arith.andi %35, %37 : vector<16x1xi1>
    %cst_12 = arith.constant 0.000000e+00 : f32
    %39 = vector.broadcast %cst_12 : f32 to vector<16x1xf32>
    %40 = arith.select %38, %29, %39 : vector<16x1xi1>, vector<16x1xf32>
    %41 = vector.shape_cast %40 : vector<16x1xf32> to vector<1x1x16xf32>
    %c0_13 = arith.constant 0 : index
    %c0_14 = arith.constant 0 : index
    %c0_15 = arith.constant 0 : index
    %42 = vector.load %arg3[%c0_13, %c0_14, %c0_15] : memref<1x1x16xf32, #tpu.memory_space<vmem>>, vector<1x1x16xf32>
    tpu.vector_store %arg3[%c0_13, %c0_14, %c0_15], %41 {strides = array<i32>} : memref<1x1x16xf32, #tpu.memory_space<vmem>>, vector<1x1x16xf32>,
    return
  }
  func.func @transform_0(%arg0: i32) -> (i32, i32) {
    %c0_i32 = arith.constant 0 : i32
    %c0_i32_0 = arith.constant 0 : i32
    return %arg0, %c0_i32 : i32, i32
  }
  func.func @transform_1(%arg0: i32) -> (i32, i32) {
    %c0_i32 = arith.constant 0 : i32
    %c0_i32_0 = arith.constant 0 : i32
    return %arg0, %c0_i32 : i32, i32
  }
  func.func @transform_2(%arg0: i32) -> (i32, i32, i32) {
    %c0_i32 = arith.constant 0 : i32
    %c0_i32_0 = arith.constant 0 : i32
    %c0_i32_1 = arith.constant 0 : i32
    return %arg0, %c0_i32, %c0_i32_0 : i32, i32, i32
  }
}

</mosaic_0001>

<bundles_post_ra>
// kernel: tpu_custom_call.1
= control target key start
LH: loop header
LB: loop body
LE: loop exit
PB: predicated region body
PF: predicated region fallthrough
CT: control target
= control target key end

     0   :  { %vm16_vm0 = vcmask 261120   ;;  %v164_v4 = vmov 0   ;;  %s221_s0 = inlined_call_operand.vmem [shape: f32[16,32], index: 0, kind: input, shape index: {}]   ;;  %s222_s1 = inlined_call_operand.vmem [shape: s32[16,1], index: 1, kind: input, shape index: {}]   ;;  %s223_s2 = inlined_call_operand.hbm [shape: f32[1,1,16], index: 2, kind: output, shape index: {}]  }
   0x1   :  { %v12_v0 = vld [vmem:[%s221_s0] sm:$0xff]  ;;  %v13_v1 = vld [vmem:[%s221_s0 + $0x8] sm:$0xff]  ;;  %130 = vset.pattern.permute.xlu1 %v164_v4  ;;  %131 = vset.pattern.permute.xlu0 %v164_v4 }
   0x2   :  { %v190_v2 = vld [vmem:[%s222_s1] sm:$0xff]  ;;  %v17_v3 = vsel %vm16_vm0, %v12_v0, -inf }
   0x3   :  { %7 = vsyncpa [#allocation3], 0  ;;  %18 = vmax.xlane.f32.xlu0 %v17_v3  ;;  %48 = vperm.xlu1 %130, %v190_v2   ;;  %v20_v5 = vsel %vm16_vm0, %v13_v1, -inf  ;;  %v198_v6 = vld [vmem:[%s222_s1 + $0x8] sm:$0xff]  ;;  %v39_v13 = vlaneseq  ;;  %vm86_vm3 = vcmp.ne.s32.totalorder %v190_v2, 4294967196  ;;  %s165_s0 = smov [#allocation2]  }
   0x4   :  { %vm87_vm4 = vcmp.ne.s32.totalorder %v198_v6, 4294967196  ;;  %s120_s1 = sshll.u32 %s165_s0, 4  ;;  %vm109_vm5 = vcmask 130112   ;;  %vm112_vm6 = vcmask 122880   ;;  %s121_s1 = int_to_ptr.vmem [resolvable:$true] %s120_s1 }
   0x5   :  { %v40_v17 = vand.u32 127, %v39_v13  ;;  %v101_v53 = vshrl.u32 %v39_v13, 7  ;;  %s140_s17 = scalar_lea.vmem %s121_s1, 16  ;;  %s144_s18 = scalar_lea.vmem %s121_s1, 32 }
   0x6   :  { %p141_p0 = scmp.ne.s32.totalorder %s121_s1, %s140_s17  ;;  %p145_p1 = scmp.lt.s32.totalorder %s121_s1, %s121_s1 }
   0x7   :  { %21 = vmax.xlane.f32.xlu0 %v20_v5  ;;  %51 = vperm.xlu1 %130, %v198_v6   ;;  %v104_v54 = vadd.s32 4294967288, %v40_v17  ;;  %v102_v55 = vsub.s32 %v40_v17, %v101_v53  ;;  %p146_p2 = scmp.lt.s32.totalorder %s144_s18, %s140_s17 }
   0x9   :  { %v107_v56 = vsub.s32 %v104_v54, %v101_v53  ;;  %p147_p3 = por %p146_p2, %p145_p1 }
   0xb   :  { %p148_p4 = pnand %p147_p3, %p141_p0 }
  0x82   :  { %v49_v16 = vpop.permute.xlu1 %48 }
  0x83   :  { %vm53_vm1 = vcmp.eq.s32.totalorder %v40_v17, %v49_v16 }
  0x86   :  { %v52_v21 = vpop.permute.xlu1 %51 }
  0x87   :  { %vm54_vm2 = vcmp.eq.s32.totalorder %v40_v17, %v52_v21 }
  0x90   :  { %v19_v7 = vpop.xlane.xlu0 %18 }
  0x91   :  { %v23_v8 = vsub.f32 %v12_v0, %v19_v7 }
  0x93   :  { %v25_v9 = vmul.f32 1.442695, %v23_v8  ;;  %v41_v19 = vsel %vm16_vm0, %v23_v8, 0.0  ;;  %v55_v23 = vsel %vm53_vm1, %v23_v8, 0.0 }
  0x94   :  { %v22_v10 = vpop.xlane.xlu0 %21  ;;  %v57_v24 = vsel %vm16_vm0, %v55_v23, 0.0 }
  0x95   :  { %132 = vpow2.f32 %v25_v9  ;;  %v24_v11 = vsub.f32 %v13_v1, %v22_v10 }
  0x97   :  { %v27_v12 = vmul.f32 1.442695, %v24_v11  ;;  %v44_v22 = vsel %vm16_vm0, %v24_v11, 0.0  ;;  %v56_v25 = vsel %vm54_vm2, %v24_v11, 0.0 }
  0x98   :  { %v60_v26 = vsel %vm16_vm0, %v56_v25, 0.0 }
  0x99   :  { %134 = vpow2.f32 %v27_v12 }
  0x9f   :  { %v133_v14 = vpop.eup %132 }
  0xa0   :  { %v29_v15 = vsel %vm16_vm0, %v133_v14, 0.0 }
  0xa1   :  { %30 = vadd.xlane.f32.xlu0 %v29_v15 }
  0xa3   :  { %v135_v18 = vpop.eup %134 }
  0xa4   :  { %v32_v20 = vsel %vm16_vm0, %v135_v18, 0.0 }
  0xa5   :  { %42 = vadd.xlane.f32.xlu0 %v41_v19  ;;  %33 = vadd.xlane.f32.xlu1 %v32_v20 }
  0xa9   :  { %45 = vadd.xlane.f32.xlu0 %v44_v22 }
  0xad   :  { %58 = vadd.xlane.f32.xlu0 %v57_v24 }
  0xb1   :  { %61 = vadd.xlane.f32.xlu0 %v60_v26 }
 0x12e   :  { %v31_v27 = vpop.xlane.xlu0 %30 }
 0x12f   :  { %136 = vlog2.f32 %v31_v27 }
 0x132   :  { %v34_v28 = vpop.xlane.xlu1 %33  ;;  %v43_v29 = vpop.xlane.xlu0 %42 }
 0x133   :  { %138 = vlog2.f32 %v34_v28 }
 0x136   :  { %v46_v30 = vpop.xlane.xlu0 %45 }
 0x139   :  { %v137_v31 = vpop.eup %136 }
 0x13a   :  { %v36_v32 = vmul.f32 0.6931472, %v137_v31  ;;  %v59_v33 = vpop.xlane.xlu0 %58 }
 0x13c   :  { %v63_v34 = vmul.f32 32.0, %v36_v32  ;;  %v69_v35 = vsub.f32 %v59_v33, %v36_v32 }
 0x13d   :  { %v139_v36 = vpop.eup %138 }
 0x13e   :  { %v38_v37 = vmul.f32 0.6931472, %v139_v36  ;;  %v65_v38 = vsub.f32 %v43_v29, %v63_v34  ;;  %v62_v39 = vpop.xlane.xlu0 %61  ;;  %v71_v42 = vmul.f32 0.896875, %v69_v35 }
 0x140   :  { %v67_v40 = vmul.f32 0.003125, %v65_v38  ;;  %v64_v41 = vmul.f32 32.0, %v38_v37  ;;  %v70_v43 = vsub.f32 %v62_v39, %v38_v37 }
 0x142   :  { %v66_v44 = vsub.f32 %v46_v30, %v64_v41  ;;  %v73_v45 = vadd.f32 %v71_v42, %v67_v40  ;;  %v72_v48 = vmul.f32 0.896875, %v70_v43 }
 0x144   :  { %v68_v46 = vmul.f32 0.003125, %v66_v44  ;;  %v75_v47 = vsub.f32 0.0, %v73_v45 }
 0x146   :  { %v74_v49 = vadd.f32 %v72_v48, %v68_v46  ;;  %v90_v50 = vsel %vm86_vm3, %v75_v47, 0.0 }
 0x147   :  { %95 = vperm.xlu0 %131, %v90_v50  }
 0x148   :  { %v76_v51 = vsub.f32 0.0, %v74_v49 }
 0x14a   :  { %v91_v52 = vsel %vm87_vm4, %v76_v51, 0.0 }
 0x14b   :  { %98 = vperm.xlu1 %130, %v91_v52  }
 0x1c6   :  { %v96_v57 = vpop.permute.xlu0 %95 }
 0x1c7   :  { %v103_v59 = vrot.slane %v96_v57, %v102_v55 }
 0x1ca   :  { %v99_v58 = vpop.permute.xlu1 %98 }
 0x1cb   :  { %v108_v60 = vrot.slane %v99_v58, %v107_v56 }
 0x1cd   :  { %v110_v61 = vsel %vm109_vm5, %v108_v60, %v103_v59 }
 0x1ce   :  { %113 = vst.msk [vmem:[#allocation2] sm:$0x1] %vm112_vm6, %v110_v61 }
 0x1cf   :  { %151 = shalt.err (!%p148_p4)
}
 0x1d0   :  { %s152_s21 = scalar_lea.hbm %s223_s2, 16 }
 0x1d1   :  { %p153_p5 = scmp.ne.s32.totalorder %s223_s2, %s152_s21  ;;  %p156_p6 = scmp.lt.u32.totalorder %s152_s21, %s223_s2 }
 0x1d3   :  { %p158_p7 = pnand %p156_p6, %p153_p5 }
 0x1d5   :  { %161 = shalt.err (!%p158_p7)
}
 0x1d6   :  { %123 = dma.vmem_to_hbm [thread:$0]  %s121_s1, 16, %s223_s2, [#allocation3]  }
 0x1d7   :  { %162 = dma.done.wait [#allocation3], 16  }
 0x1d8   :  { %163 = vsyncadd [#allocation3], 4294967280 }
 0x1d9   :  { %127 = vsyncpa [#allocation3], 1 }

</bundles_post_ra>
